<compile_context>
chip_gen: v6e
topology: v6e:2x2x1
jax: 0.10.0
libtpu: 0.0.40
codegen_flags: <defaults>
</compile_context>

<pallas_src>
import functools

import jax
import jax.numpy as jnp
from jax.experimental import pallas as pl
from jax.experimental.pallas import tpu as pltpu


def ffn_kernel(x_ref, w1_ref, b1_ref, w2_ref, b2_ref, o_ref, acc_ref):
    # Grid: (m_tiles, h_tiles); h (reduction over the hidden dim) is last.
    # x_ref:  (TM, C)   compute dtype (bf16 by default)
    # w1_ref: (C, TH)   compute dtype
    # b1_ref: (1, TH)   f32
    # w2_ref: (TH, C)   compute dtype
    # b2_ref: (1, C)    f32
    # o_ref:  (TM, C)   output dtype (same block across h -> resident)
    # acc_ref:(TM, C)   f32 VMEM accumulator
    h_idx = pl.program_id(1)

    # First matmul on this hidden-dim slice, f32 accumulation on the MXU.
    h = jnp.dot(x_ref[...], w1_ref[...], preferred_element_type=jnp.float32)
    h = h + b1_ref[...]           # bias in f32
    h = jnp.maximum(h, 0.0)       # ReLU in f32

    # Second matmul: partial contraction over this hidden slice, f32 result.
    partial = jnp.dot(
        h.astype(w2_ref.dtype), w2_ref[...], preferred_element_type=jnp.float32
    )

    @pl.when(h_idx == 0)
    def _():
        acc_ref[...] = partial

    @pl.when(h_idx > 0)
    def _():
        acc_ref[...] += partial

    @pl.when(h_idx == pl.num_programs(1) - 1)
    def _():
        o_ref[...] = (acc_ref[...] + b2_ref[...]).astype(o_ref.dtype)


def _round_up(x, m):
    return ((x + m - 1) // m) * m


def _pick_tile_h(H):
    for th in (512, 256, 128):
        if H % th == 0:
            return th
    return H  # fallback: whole hidden dim as one block


def _pick_tile_m(M, requested):
    if requested is not None:
        return max(8, min(requested, _round_up(M, 8)))
    # Adaptive: biggest of {512, 256, 128, ...} that doesn't exceed the rows.
    for tm in (512, 256, 128, 64, 32, 16, 8):
        if M >= tm:
            return tm
    return 8


@functools.partial(jax.jit, static_argnames=("tile_m", "tile_h", "compute_dtype"))
def feed_forward(x, w1, b1, w2, b2, *, tile_m=None, tile_h=512,
                 compute_dtype=jnp.bfloat16):
    """x: (B, T, C). Returns (B, T, C) in x.dtype (eval-mode FFN forward)."""
    B, T, C = x.shape
    H = w1.shape[1]
    M = B * T

    tile_m = _pick_tile_m(M, tile_m)
    if H % tile_h != 0:
        tile_h = _pick_tile_h(H)

    # Cast matmul operands to the compute dtype (bf16 -> native MXU rate and
    # half the weight DMA bytes); biases stay f32.
    x2d = x.reshape(M, C).astype(compute_dtype)
    w1c = w1.astype(compute_dtype)
    w2c = w2.astype(compute_dtype)
    b1_2d = b1.reshape(1, H).astype(jnp.float32)
    b2_2d = b2.reshape(1, C).astype(jnp.float32)

    grid = (pl.cdiv(M, tile_m), H // tile_h)

    # VMEM budget (double-buffered inputs/outputs + f32 accumulator + hidden).
    cbytes = jnp.dtype(compute_dtype).itemsize
    vmem_est = (
        2 * tile_m * C * cbytes                     # x tile
        + 2 * (C * tile_h + tile_h * C) * cbytes    # W1 / W2 blocks
        + 2 * (tile_h + C) * 4                      # biases
        + 2 * tile_m * C * 4                        # output tile
        + tile_m * C * 4                            # accumulator
        + tile_m * tile_h * (4 + cbytes)            # hidden intermediate
    )
    vmem_limit = int(min(max(2 * vmem_est, 32 * 1024 * 1024), 56 * 1024 * 1024))

    cost = pl.CostEstimate(
        flops=4 * M * C * H,
        transcendentals=0,
        bytes_accessed=(M * C * (cbytes + x.dtype.itemsize)
                        + (C * H + H * C) * cbytes + (H + C) * 4),
    )

    out = pl.pallas_call(
        ffn_kernel,
        out_shape=jax.ShapeDtypeStruct((M, C), x.dtype),
        grid_spec=pltpu.PrefetchScalarGridSpec(
            num_scalar_prefetch=0,
            grid=grid,
            in_specs=[
                pl.BlockSpec((tile_m, C), lambda i, h: (i, 0)),    # x rows tile
                pl.BlockSpec((C, tile_h), lambda i, h: (0, h)),    # W1 column block
                pl.BlockSpec((1, tile_h), lambda i, h: (0, h)),    # b1 slice
                pl.BlockSpec((tile_h, C), lambda i, h: (h, 0)),    # W2 row block
                pl.BlockSpec((1, C), lambda i, h: (0, 0)),         # b2
            ],
            out_specs=pl.BlockSpec((tile_m, C), lambda i, h: (i, 0)),
            scratch_shapes=[pltpu.VMEM((tile_m, C), jnp.float32)],
        ),
        compiler_params=pltpu.CompilerParams(
            dimension_semantics=("parallel", "arbitrary"),
            vmem_limit_bytes=vmem_limit,
        ),
        cost_estimate=cost,
    )(x2d, w1c, b1_2d, w2c, b2_2d)

    return out.reshape(B, T, C)


def init_params(key, n_embd):
    """Mirrors nn.Linear default init: U(-1/sqrt(fan_in), 1/sqrt(fan_in))."""
    hidden = 4 * n_embd
    k1, k2, k3, k4 = jax.random.split(key, 4)
    bnd1 = 1.0 / jnp.sqrt(n_embd)
    bnd2 = 1.0 / jnp.sqrt(hidden)
    # PyTorch stores Linear weight as (out, in); we keep (in, out) for x @ W.
    w1 = jax.random.uniform(k1, (n_embd, hidden), jnp.float32, -bnd1, bnd1)
    b1 = jax.random.uniform(k2, (hidden,), jnp.float32, -bnd1, bnd1)
    w2 = jax.random.uniform(k3, (hidden, n_embd), jnp.float32, -bnd2, bnd2)
    b2 = jax.random.uniform(k4, (n_embd,), jnp.float32, -bnd2, bnd2)
    return w1, b1, w2, b2


if __name__ == "__main__":
    # Small shapes consistent with the module (lane-dense C, H multiples of 128):
    # batch=2, seq=128, n_embd=128 -> hidden=512.
    B, T, C = 2, 128, 128
    key = jax.random.PRNGKey(0)
    kx, kp = jax.random.split(key)

    x = jax.random.normal(kx, (B, T, C), dtype=jnp.float32)
    w1, b1, w2, b2 = init_params(kp, C)

    # tile_m=128 -> 2 parallel M steps; tile_h=256 -> 2 reduction steps.
    out = feed_forward(x, w1, b1, w2, b2, tile_m=128, tile_h=256)
    out = jax.block_until_ready(out)

    # Reference in plain JAX mirroring the kernel's bf16-matmul / f32-accumulate
    # semantics (eval-mode dropout = identity).
    xb = x.reshape(-1, C).astype(jnp.bfloat16)
    h_ref = jnp.maximum(
        jnp.dot(xb, w1.astype(jnp.bfloat16), preferred_element_type=jnp.float32)
        + b1, 0.0)
    ref = (jnp.dot(h_ref.astype(jnp.bfloat16), w2.astype(jnp.bfloat16),
                   preferred_element_type=jnp.float32) + b2)
    ref = ref.astype(x.dtype).reshape(B, T, C)

    assert out.shape == (B, T, C)
    assert jnp.allclose(out, ref, atol=1e-2, rtol=1e-2), "mismatch vs reference"

    print("KERNEL_OK")
</pallas_src>

<mosaic_0001>
module attributes {stable_mosaic.version = 11 : i64} {
  func.func @ffn_kernel(%arg0: i32, %arg1: i32, %arg2: memref<128x128xbf16, #tpu.memory_space<vmem>>, %arg3: memref<128x256xbf16, #tpu.memory_space<vmem>>, %arg4: memref<1x256xf32, #tpu.memory_space<vmem>>, %arg5: memref<256x128xbf16, #tpu.memory_space<vmem>>, %arg6: memref<1x128xf32, #tpu.memory_space<vmem>>, %arg7: memref<128x128xf32, #tpu.memory_space<vmem>>, %arg8: memref<128x128xf32, #tpu.memory_space<vmem>>) attributes {dimension_semantics = [#tpu.dimension_semantics<parallel>, #tpu.dimension_semantics<arbitrary>], iteration_bounds = array<i64: 2, 2>, scalar_prefetch = 0 : i64, scratch_operands = 1 : i64, tpu.core_type = #tpu.core_type<tc>, window_params = [{transform_indices = @transform_0, window_bounds = array<i64: 128, 128>}, {transform_indices = @transform_1, window_bounds = array<i64: 128, 256>}, {transform_indices = @transform_2, window_bounds = array<i64: 1, 256>}, {transform_indices = @transform_3, window_bounds = array<i64: 256, 128>}, {pipeline_mode = #tpu.pipeline_mode<synchronous>, transform_indices = @transform_4, window_bounds = array<i64: 1, 128>}, {transform_indices = @transform_5, window_bounds = array<i64: 128, 128>}]} {
    %c0 = arith.constant 0 : index
    %c0_0 = arith.constant 0 : index
    %0 = vector.load %arg2[%c0, %c0_0] : memref<128x128xbf16, #tpu.memory_space<vmem>>, vector<128x128xbf16>
    %c0_1 = arith.constant 0 : index
    %c0_2 = arith.constant 0 : index
    %1 = vector.load %arg3[%c0_1, %c0_2] : memref<128x256xbf16, #tpu.memory_space<vmem>>, vector<128x256xbf16>
    %cst = arith.constant dense<0.000000e+00> : vector<128x256xf32>
    %2 = tpu.matmul %0, %1, %cst {dimension_numbers = #tpu.dot_dimension_numbers<[1], [0], [0], [1], [0, 0, 1, 1], [], []>} : vector<128x128xbf16>, vector<128x256xbf16>, vector<128x256xf32> -> vector<128x256xf32>
    %c0_3 = arith.constant 0 : index
    %c0_4 = arith.constant 0 : index
    %3 = vector.load %arg4[%c0_3, %c0_4] : memref<1x256xf32, #tpu.memory_space<vmem>>, vector<1x256xf32>
    %4 = vector.broadcast %3 : vector<1x256xf32> to vector<128x256xf32>
    %5 = arith.addf %2, %4 : vector<128x256xf32>
    %cst_5 = arith.constant 0.000000e+00 : f32
    %6 = vector.broadcast %cst_5 : f32 to vector<128x256xf32>
    %7 = arith.maximumf %5, %6 : vector<128x256xf32>
    %8 = arith.truncf %7 : vector<128x256xf32> to vector<128x256xbf16>
    %c0_6 = arith.constant 0 : index
    %c0_7 = arith.constant 0 : index
    %9 = vector.load %arg5[%c0_6, %c0_7] : memref<256x128xbf16, #tpu.memory_space<vmem>>, vector<256x128xbf16>
    %cst_8 = arith.constant dense<0.000000e+00> : vector<128x128xf32>
    %10 = tpu.matmul %8, %9, %cst_8 {dimension_numbers = #tpu.dot_dimension_numbers<[1], [0], [0], [1], [0, 0, 1, 1], [], []>} : vector<128x256xbf16>, vector<256x128xbf16>, vector<128x128xf32> -> vector<128x128xf32>
    %c0_i32 = arith.constant 0 : i32
    %11 = arith.cmpi eq, %arg1, %c0_i32 : i32
    %12 = arith.extui %11 : i1 to i32
    %c0_i32_9 = arith.constant 0 : i32
    %13 = arith.cmpi ne, %12, %c0_i32_9 : i32
    scf.if %13 {
      %c0_13 = arith.constant 0 : index
      %c0_14 = arith.constant 0 : index
      %20 = vector.load %arg8[%c0_13, %c0_14] : memref<128x128xf32, #tpu.memory_space<vmem>>, vector<128x128xf32>
      tpu.vector_store %arg8[%c0_13, %c0_14], %10 {strides = array<i32>} : memref<128x128xf32, #tpu.memory_space<vmem>>, vector<128x128xf32>,
    } else {
    }
    %c0_i32_10 = arith.constant 0 : i32
    %14 = arith.cmpi sgt, %arg1, %c0_i32_10 : i32
    %15 = arith.extui %14 : i1 to i32
    %c0_i32_11 = arith.constant 0 : i32
    %16 = arith.cmpi ne, %15, %c0_i32_11 : i32
    scf.if %16 {
      %c0_13 = arith.constant 0 : index
      %c0_14 = arith.constant 0 : index
      %20 = vector.load %arg8[%c0_13, %c0_14] : memref<128x128xf32, #tpu.memory_space<vmem>>, vector<128x128xf32>
      %21 = arith.addf %20, %10 : vector<128x128xf32>
      %c0_15 = arith.constant 0 : index
      %c0_16 = arith.constant 0 : index
      %22 = vector.load %arg8[%c0_15, %c0_16] : memref<128x128xf32, #tpu.memory_space<vmem>>, vector<128x128xf32>
      tpu.vector_store %arg8[%c0_15, %c0_16], %21 {strides = array<i32>} : memref<128x128xf32, #tpu.memory_space<vmem>>, vector<128x128xf32>,
    } else {
    }
    %c1_i32 = arith.constant 1 : i32
    %17 = arith.cmpi eq, %arg1, %c1_i32 : i32
    %18 = arith.extui %17 : i1 to i32
    %c0_i32_12 = arith.constant 0 : i32
    %19 = arith.cmpi ne, %18, %c0_i32_12 : i32
    scf.if %19 {
      %c0_13 = arith.constant 0 : index
      %c0_14 = arith.constant 0 : index
      %20 = vector.load %arg8[%c0_13, %c0_14] : memref<128x128xf32, #tpu.memory_space<vmem>>, vector<128x128xf32>
      %c0_15 = arith.constant 0 : index
      %c0_16 = arith.constant 0 : index
      %21 = vector.load %arg6[%c0_15, %c0_16] : memref<1x128xf32, #tpu.memory_space<vmem>>, vector<1x128xf32>
      %22 = vector.broadcast %21 : vector<1x128xf32> to vector<128x128xf32>
      %23 = arith.addf %20, %22 : vector<128x128xf32>
      %c0_17 = arith.constant 0 : index
      %c0_18 = arith.constant 0 : index
      %24 = vector.load %arg7[%c0_17, %c0_18] : memref<128x128xf32, #tpu.memory_space<vmem>>, vector<128x128xf32>
      tpu.vector_store %arg7[%c0_17, %c0_18], %23 {strides = array<i32>} : memref<128x128xf32, #tpu.memory_space<vmem>>, vector<128x128xf32>,
    } else {
    }
    return
  }
  func.func @transform_0(%arg0: i32, %arg1: i32) -> (i32, i32) {
    %c0_i32 = arith.constant 0 : i32
    %c0_i32_0 = arith.constant 0 : i32
    return %arg0, %c0_i32 : i32, i32
  }
  func.func @transform_1(%arg0: i32, %arg1: i32) -> (i32, i32) {
    %c0_i32 = arith.constant 0 : i32
    %c0_i32_0 = arith.constant 0 : i32
    return %c0_i32, %arg1 : i32, i32
  }
  func.func @transform_2(%arg0: i32, %arg1: i32) -> (i32, i32) {
    %c0_i32 = arith.constant 0 : i32
    %c0_i32_0 = arith.constant 0 : i32
    return %c0_i32, %arg1 : i32, i32
  }
  func.func @transform_3(%arg0: i32, %arg1: i32) -> (i32, i32) {
    %c0_i32 = arith.constant 0 : i32
    %c0_i32_0 = arith.constant 0 : i32
    return %arg1, %c0_i32 : i32, i32
  }
  func.func @transform_4(%arg0: i32, %arg1: i32) -> (i32, i32) {
    %c0_i32 = arith.constant 0 : i32
    %c0_i32_0 = arith.constant 0 : i32
    %c0_i32_1 = arith.constant 0 : i32
    return %c0_i32, %c0_i32_0 : i32, i32
  }
  func.func @transform_5(%arg0: i32, %arg1: i32) -> (i32, i32) {
    %c0_i32 = arith.constant 0 : i32
    %c0_i32_0 = arith.constant 0 : i32
    return %arg0, %c0_i32 : i32, i32
  }
}

</mosaic_0001>

<bundles_post_ra>
// kernel: feed_forward.1
= control target key start
LH: loop header
LB: loop body
LE: loop exit
PB: predicated region body
PF: predicated region fallthrough
CT: control target
= control target key end

     0   :  { %s2007_s0 = inlined_call_operand.vmem [shape: bf16[256,128], index: 0, kind: input, shape index: {}]   ;;  %s2008_s1 = inlined_call_operand.vmem [shape: bf16[128,512], index: 1, kind: input, shape index: {}]   ;;  %s2009_s2 = inlined_call_operand.vmem [shape: f32[1,512], index: 2, kind: input, shape index: {}]   ;;  %s2010_s3 = inlined_call_operand.vmem [shape: bf16[512,128], index: 3, kind: input, shape index: {}]   ;;  %s2011_s4 = inlined_call_operand.vmem [shape: f32[1,128], index: 4, kind: input, shape index: {}]   ;;  %s2012_s5 = inlined_call_operand.hbm [shape: f32[256,128], index: 5, kind: output, shape index: {}]  }
   0x1   :  { %2014 = sst [smem:[#allocation7_spill]] %s2008_s1 }
   0x2   :  { %10 = vsyncpa [#allocation5], 0 }
   0x3   :  { %12 = vsyncpa [#allocation5 + $0x1], 0  ;;  %s1624_s18 = smov 0   ;;  %s1626_s19 = smov 0  }
   0x4   :  { %s1628_s20 = smov 0   ;;  %s1630_s21 = smov 0  }
   0x5   :  { %s1632_s22 = smov 0   ;;  %s1634_s23 = smov 0  }
   0x6   :  { %s1636_s24 = smov 0   ;;  %s1638_s25 = smov 0  }
   0x7   :  { %s1640_s26 = smov 0   ;;  %s1642_s27 = smov 0  }
   0x8 LB: > { %s1212_s28 = sadd.s32 4294967295, %s1588_s27   ;;  %s1213_s29 = sadd.s32 4294967294, %s1588_s27   ;;  %s1588_s27 = sphi %s1642_s27, %s18_s27   ;;  %s1584_s26 = sphi %s1640_s26, %s2028_s26   ;;  %s1580_s25 = sphi %s1638_s25, %s2027_s25   ;;  %s1576_s24 = sphi %s1636_s24, %s2026_s24   ;;  %s1572_s23 = sphi %s1634_s23, %s2025_s23   ;;  %s1568_s22 = sphi %s1632_s22, %s2024_s22   ;;  %s1564_s21 = sphi %s1630_s21, %s2023_s21   ;;  %s1560_s20 = sphi %s1628_s20, %s2022_s20   ;;  %s1556_s19 = sphi %s1626_s19, %s2021_s19   ;;  %s1552_s18 = sphi %s1624_s18, %s2020_s18  }
   0x9   : > { %s27_s30 = sadd.s32 1, %s1580_s25  ;;  %s30_s6 = sadd.s32 1, %s1584_s26 }
   0xa   : > { %p28_p0 = scmp.ge.s32.totalorder %s27_s30, 2  ;;  %s63_s7 = sadd.s32 1, %s1568_s22 }
   0xb   : > { %p70_p1 = scmp.ne.s32.totalorder %s1568_s22, %s1564_s21  ;;  %p71_p2 = scmp.eq.s32.totalorder %s1588_s27, 0 }
   0xc   : > { %s2030_s30 = smov (%p28_p0, %s27_s30), 0  ;;  %s2032_s6 = smov (!%p28_p0, %s30_s6), %s1584_s26 }
   0xd   : > { %s60_s8 = ssub.s32 %s1580_s25, %s2030_s30  ;;  %p1687_p3 = por %p71_p2, %p70_p1 }
   0xe   : > { %p32_p4 = scmp.ge.s32.totalorder %s2032_s6, 2  ;;  %p61_p5 = scmp.eq.s32.totalorder %s60_s8, 0 }
   0xf   : > { %s162_s10 = sadd.s32 1, %s1560_s20  ;;  %p172_p6 = scmp.ne.s32.totalorder %s1560_s20, %s1556_s19 }
  0x10   : > { %s2034_s6 = smov (%p32_p4, %s2032_s6), 0  ;;  %p173_p7 = scmp.eq.s32.totalorder %s1212_s28, 3 }
  0x11   : > { %s1697_s11 = scalar_select %p61_p5, %s1568_s22, %s63_s7  }
  0x12   : > { %s159_s12 = ssub.s32 %s1584_s26, %s2034_s6  ;;  %p178_p9 = scmp.ne.s32.totalorder %s1556_s19, %s1552_s18 }
  0x13   : > { %p160_p8 = scmp.eq.s32.totalorder %s159_s12, 0  ;;  %p1703_p10 = por %p173_p7, %p172_p6 }
  0x14   : > { %p179_p11 = scmp.eq.s32.totalorder %s1213_s29, 3  ;;  %p1215_p13 = scmp.ge.s32.totalorder %s1588_s27, 4 }
  0x15   : > { %s1708_s14 = scalar_select %p160_p8, %s1560_s20, %s162_s10  }
  0x16   : > { %p1710_p12 = por %p179_p11, %p178_p9  ;;  %198 = sbr.rel (%p1215_p13) target bundleno = 45 (0x2d), region = 20 }
  0x1b   : > { %210 = sbr.rel (!%p1687_p3) target bundleno = 45 (0x2d), region = 28  ;;  %s212_s16 = sand.u32 (%p1687_p3), 1, %s1568_s22  }
  0x1c   : > { %s1276_s17 = sshll.u32 (%p1687_p3), %s1580_s25, 3  ;;  %s1216_s28 = sshll.u32 (%p1687_p3), %s212_s16, 7 }
  0x1d   : > { %s2018_s1 = sld [smem:[#allocation7_spill]] (%p1687_p3)  ;;  %s214_s9 = scalar_lea.vmem (%p1687_p3), [#allocation3], %s1216_s28 }
  0x23   : > { %s1722_s29 = scalar_lea.vmem %s2018_s1, %s1276_s17 }
  0x24   : > { %v276_v0 = vld [vmem:[%s1722_s29] sm:$0xff]  ;;  %v278_v1 = vld [vmem:[%s1722_s29 + $0x10] sm:$0xff] }
  0x25   : > { %v280_v2 = vld [vmem:[%s1722_s29 + $0x20] sm:$0xff]  ;;  %277 = vst [vmem:[%s214_s9] sm:$0xff] %v276_v0  ;;  %279 = vst [vmem:[%s214_s9 + $0x8] sm:$0xff] %v278_v1  ;;  %v282_v3 = vld [vmem:[%s1722_s29 + $0x30] sm:$0xff] }
  0x26   : > { %281 = vst [vmem:[%s214_s9 + $0x10] sm:$0xff] %v280_v2  ;;  %v284_v4 = vld [vmem:[%s1722_s29 + $0x40] sm:$0xff]  ;;  %v286_v5 = vld [vmem:[%s1722_s29 + $0x50] sm:$0xff]  ;;  %283 = vst [vmem:[%s214_s9 + $0x18] sm:$0xff] %v282_v3 }
  0x27   : > { %285 = vst [vmem:[%s214_s9 + $0x20] sm:$0xff] %v284_v4  ;;  %287 = vst [vmem:[%s214_s9 + $0x28] sm:$0xff] %v286_v5  ;;  %v288_v6 = vld [vmem:[%s1722_s29 + $0x60] sm:$0xff]  ;;  %v290_v7 = vld [vmem:[%s1722_s29 + $0x70] sm:$0xff] }
  0x28   : > { %v292_v8 = vld [vmem:[%s1722_s29 + $0x80] sm:$0xff]  ;;  %289 = vst [vmem:[%s214_s9 + $0x30] sm:$0xff] %v288_v6  ;;  %291 = vst [vmem:[%s214_s9 + $0x38] sm:$0xff] %v290_v7  ;;  %v294_v9 = vld [vmem:[%s1722_s29 + $0x90] sm:$0xff] }
  0x29   : > { %293 = vst [vmem:[%s214_s9 + $0x40] sm:$0xff] %v292_v8  ;;  %v296_v10 = vld [vmem:[%s1722_s29 + $0xa0] sm:$0xff]  ;;  %v298_v11 = vld [vmem:[%s1722_s29 + $0xb0] sm:$0xff]  ;;  %295 = vst [vmem:[%s214_s9 + $0x48] sm:$0xff] %v294_v9 }
  0x2a   : > { %297 = vst [vmem:[%s214_s9 + $0x50] sm:$0xff] %v296_v10  ;;  %299 = vst [vmem:[%s214_s9 + $0x58] sm:$0xff] %v298_v11  ;;  %v300_v12 = vld [vmem:[%s1722_s29 + $0xc0] sm:$0xff]  ;;  %v302_v13 = vld [vmem:[%s1722_s29 + $0xd0] sm:$0xff] }
  0x2b   : > { %v304_v14 = vld [vmem:[%s1722_s29 + $0xe0] sm:$0xff]  ;;  %301 = vst [vmem:[%s214_s9 + $0x60] sm:$0xff] %v300_v12  ;;  %303 = vst [vmem:[%s214_s9 + $0x68] sm:$0xff] %v302_v13  ;;  %v306_v15 = vld [vmem:[%s1722_s29 + $0xf0] sm:$0xff] }
  0x2c   : > { %305 = vst [vmem:[%s214_s9 + $0x70] sm:$0xff] %v304_v14  ;;  %307 = vst [vmem:[%s214_s9 + $0x78] sm:$0xff] %v306_v15 }
  0x2d PF: > { %p1219_p0 = scmp.ge.s32.totalorder %s1588_s27, 1  ;;  %p329_p1 = scmp.lt.s32.totalorder %s1588_s27, 5 }
  0x2f   : > { %p330_p2 = pnand %p1219_p0, %p329_p1 }
  0x30   : > { %s336_s10 = sand.u32 (!%p330_p2), 1, %s1564_s21   ;;  %s2013_s12 = sand.u32 (!%p330_p2), 1, %s1556_s19  }
  0x31   : > { %333 = sbr.rel (%p330_p2) target bundleno = 618 (0x26a), region = 74  ;;  %s1220_s16 = sshll.u32 (!%p330_p2), %s336_s10, 7 }
  0x32   : > { %s1746_s17 = sshll.u32 (!%p330_p2), %s2013_s12, 7  ;;  %s1749_s28 = scalar_lea.vmem (!%p330_p2), [#allocation3], %s1220_s16 }
  0x33   : > { %s1222_s7 = sshll.u32 (!%p330_p2), %s1576_s24, 4  ;;  %s1225_s21 = sshll.u32 (!%p330_p2), %s1572_s23, 5 }
  0x34   : > { %p378_p3 = scmp.lt.s32.totalorder (!%p330_p2), %s1222_s7, 31  ;;  %p390_p4 = scmp.lt.s32.totalorder (!%p330_p2), %s1225_s21, 63 }
  0x35   : > { %s1224_s12 = sshll.u32 (!%p330_p2), %s1572_s23, 1  ;;  %p1267_p6 = scmp.ne.s32.totalorder (!%p330_p2), %s1572_s23, 0 }
  0x36   : > { %v1590_v16 = vmov 0   ;;  %v1432_v17 = vld [vmem:[%s1749_s28 + $0x74] ss:$8 sps:$4 sm:$0xff]   ;;  %v1434_v18 = vld [vmem:[%s1749_s28 + $0x70] ss:$8 sps:$4 sm:$0xff]   ;;  %s2036_s7 = smov (!%p378_p3, %s1222_s7), 31  ;;  %v431_v57 = vlaneseq }
  0x37   : > { %601 = vmatprep.mubr.bf16.mxu0 %v1590_v16  ;;  %569 = vmatprep.subr.bf16.mxu0 %v1432_v17  ;;  %v1435_v19 = vld [vmem:[%s1749_s28 + $0x64] ss:$8 sps:$4 sm:$0xff]   ;;  %v1437_v20 = vld [vmem:[%s1749_s28 + $0x60] ss:$8 sps:$4 sm:$0xff]   ;;  %v1438_v21 = vld [vmem:[%s1749_s28 + $0x54] ss:$8 sps:$4 sm:$0xff]  }
  0x38   : > { %570 = vmatpush1.bf16.msra.mxu0 %v1434_v18  ;;  %s1223_s8 = sshll.u32 %s2036_s7, 2  ;;  %v1440_v22 = vld [vmem:[%s1749_s28 + $0x50] ss:$8 sps:$4 sm:$0xff]   ;;  %v1441_v23 = vld [vmem:[%s1749_s28 + $0x44] ss:$8 sps:$4 sm:$0xff]   ;;  %s2038_s21 = smov (!%p390_p4, %s1225_s21), 63 }
  0x39   : > { %571 = vmatprep.subr.bf16.mxu0 %v1435_v19  ;;  %s1763_s10 = scalar_lea.vmem %s2007_s0, %s1223_s8  ;;  %v1443_v24 = vld [vmem:[%s1749_s28 + $0x40] ss:$8 sps:$4 sm:$0xff]   ;;  %v1444_v25 = vld [vmem:[%s1749_s28 + $0x34] ss:$8 sps:$4 sm:$0xff]   ;;  %s1226_s16 = sshll.u32 %s2038_s21, 2  ;;  %v432_v58 = vshrl.u32 %v431_v57, 7 }
  0x3a   : > { %v1446_v26 = vld [vmem:[%s1749_s28 + $0x30] ss:$8 sps:$4 sm:$0xff]   ;;  %v1447_v27 = vld [vmem:[%s1749_s28 + $0x24] ss:$8 sps:$4 sm:$0xff]   ;;  %s1772_s1 = scalar_lea.vmem %s2010_s3, %s1226_s16  ;;  %v1449_v28 = vld [vmem:[%s1749_s28 + $0x20] ss:$8 sps:$4 sm:$0xff]  }
  0x3b   : > { %v1450_v29 = vld [vmem:[%s1749_s28 + $0x14] ss:$8 sps:$4 sm:$0xff]   ;;  %v1452_v32 = vld [vmem:[%s1749_s28 + $0x10] ss:$8 sps:$4 sm:$0xff]   ;;  %v1468_v35 = vld [vmem:[%s1772_s1 + $0x68] sm:$0xff]   ;;  %p385_p5 = scmp.lt.s32.totalorder %s1224_s12, 3 }
  0x3c   : > { %572 = vmatpush1.bf16.msra.mxu0 %v1437_v20  ;;  %v1464_v30 = vld [vmem:[%s1772_s1 + $0x78] sm:$0xff]   ;;  %v1466_v33 = vld [vmem:[%s1772_s1 + $0x70] sm:$0xff]   ;;  %v1453_v36 = vld [vmem:[%s1749_s28 + $0x4] ss:$8 sps:$4 sm:$0xff]   ;;  %v437_v59 = vsub.s32 1, %v432_v58  ;;  %v433_v60 = vsub.s32 0, %v432_v58 }
  0x3d   : > { %573 = vmatprep.subr.bf16.mxu0 %v1438_v21  ;;  %v1465_v31 = vld [vmem:[%s1772_s1 + $0x38] sm:$0xff]   ;;  %1278 = vmatprep.subr.bf16.mxu1 %v1464_v30  ;;  %v1467_v34 = vld [vmem:[%s1772_s1 + $0x30] sm:$0xff]   ;;  %v1455_v37 = vld [vmem:[%s1749_s28] ss:$8 sps:$4 sm:$0xff]   ;;  %s2040_s12 = smov (!%p385_p5, %s1224_s12), 3 }
  0x3e   : > { %1279 = vmatpush3.bf16.msra.mxu1 %v1465_v31  ;;  %v1469_v38 = vld [vmem:[%s1772_s1 + $0x28] sm:$0xff]   ;;  %v1470_v39 = vld [vmem:[%s1772_s1 + $0x60] sm:$0xff]   ;;  %v1472_v42 = vld [vmem:[%s1772_s1 + $0x58] sm:$0xff]   ;;  %s387_s8 = scalar_lea.vmem %s2009_s2, %s2040_s12 }
  0x3f   : > { %1280 = vmatprep.subr.bf16.mxu1 %v1466_v33  ;;  %v1456_v40 = vld [vmem:[%s1763_s10] sm:$0xff]   ;;  %v1473_v43 = vld [vmem:[%s1772_s1 + $0x18] sm:$0xff]   ;;  %v1457_v44 = vld [vmem:[%s1763_s10 + $0x8] sm:$0xff]  }
  0x40   : > { %574 = vmatpush1.bf16.msra.mxu0 %v1440_v22  ;;  %v1471_v41 = vld [vmem:[%s1772_s1 + $0x20] sm:$0xff]   ;;  %v1458_v45 = vld [vmem:[%s1763_s10 + $0x10] sm:$0xff]   ;;  %v1459_v46 = vld [vmem:[%s1763_s10 + $0x18] sm:$0xff]  }
  0x41   : > { %575 = vmatprep.subr.bf16.mxu0 %v1441_v23  ;;  %v1460_v47 = vld [vmem:[%s1763_s10 + $0x20] sm:$0xff]   ;;  %v1461_v48 = vld [vmem:[%s1763_s10 + $0x28] sm:$0xff]   ;;  %v1462_v49 = vld [vmem:[%s1763_s10 + $0x30] sm:$0xff]  }
  0x42   : > { %1281 = vmatpush3.bf16.msra.mxu1 %v1467_v34  ;;  %v1463_v50 = vld [vmem:[%s1763_s10 + $0x38] sm:$0xff]   ;;  %v1474_v51 = vld [vmem:[%s1772_s1 + $0x50] sm:$0xff]   ;;  %v1476_v53 = vld [vmem:[%s1772_s1 + $0x48] sm:$0xff]  }
  0x43   : > { %1282 = vmatprep.subr.bf16.mxu1 %v1468_v35  ;;  %v1475_v52 = vld [vmem:[%s1772_s1 + $0x10] sm:$0xff]   ;;  %v1477_v54 = vld [vmem:[%s1772_s1 + $0x8] sm:$0xff]   ;;  %v1478_v55 = vld [vmem:[%s1772_s1 + $0x40] sm:$0xff]  }
  0x44   : > { %576 = vmatpush1.bf16.msra.mxu0 %v1443_v24  ;;  %v1479_v56 = vld [vmem:[%s1772_s1] sm:$0xff]   ;;  %s1883_s1 = scalar_lea.vmem [#allocation4], %s1746_s17 }
  0x45   : > { %577 = vmatprep.subr.bf16.mxu0 %v1444_v25  ;;  %v429_v61 = vld [vmem:[%s387_s8] sm:$0x3] }
  0x46   : > { %1283 = vmatpush3.bf16.msra.mxu1 %v1469_v38  ;;  %v1814_v63 = vrot.slane %v429_v61, %v437_v59  ;;  %v1816_v0 = vrot.slane %v429_v61, %v433_v60 }
  0x47   : > { %1284 = vmatprep.subr.bf16.mxu1 %v1470_v39 }
  0x48   : > { %578 = vmatpush1.bf16.msra.mxu0 %v1446_v26 }
  0x49   : > { %579 = vmatprep.subr.bf16.mxu0 %v1447_v27 }
  0x4a   : > { %1285 = vmatpush3.bf16.msra.mxu1 %v1471_v41 }
  0x4b   : > { %1286 = vmatprep.subr.bf16.mxu1 %v1472_v42 }
  0x4c   : > { %580 = vmatpush1.bf16.msra.mxu0 %v1449_v28 }
  0x4d   : > { %581 = vmatprep.subr.bf16.mxu0 %v1450_v29 }
  0x4e   : > { %1287 = vmatpush3.bf16.msra.mxu1 %v1473_v43 }
  0x4f   : > { %1288 = vmatprep.subr.bf16.mxu1 %v1474_v51 }
  0x50   : > { %582 = vmatpush1.bf16.msra.mxu0 %v1452_v32 }
  0x51   : > { %583 = vmatprep.subr.bf16.mxu0 %v1453_v36 }
  0x52   : > { %1289 = vmatpush3.bf16.msra.mxu1 %v1475_v52 }
  0x53   : > { %1290 = vmatprep.subr.bf16.mxu1 %v1476_v53 }
  0x54   : > { %584 = vmatpush1.bf16.msra.mxu0 %v1455_v37 }
  0x56   : > { %1291 = vmatpush3.bf16.msra.mxu1 %v1477_v54 }
  0x57   : > { %602 = vmatmul.mubr.bf16.vlgmr.msra.gmra.mxu0 %v1456_v40  ;;  %1292 = vmatprep.subr.bf16.mxu1 %v1478_v55 }
  0x58   : > { %611 = vmatprep.mubr.bf16.mxu0 %v1590_v16 }
  0x5a   : > { %1293 = vmatpush3.bf16.msra.mxu1 %v1479_v56 }
  0x5f   : > { %612 = vmatmul.mubr.bf16.gmra.mxu0 %v1457_v44 }
  0x60   : > { %621 = vmatprep.mubr.bf16.mxu0 %v1590_v16 }
  0x67   : > { %622 = vmatmul.mubr.bf16.gmra.mxu0 %v1458_v45 }
  0x68   : > { %631 = vmatprep.mubr.bf16.mxu0 %v1590_v16 }
  0x6f   : > { %632 = vmatmul.mubr.bf16.gmra.mxu0 %v1459_v46 }
  0x70   : > { %641 = vmatprep.mubr.bf16.mxu0 %v1590_v16 }
  0x77   : > { %642 = vmatmul.mubr.bf16.gmra.mxu0 %v1460_v47 }
  0x78   : > { %651 = vmatprep.mubr.bf16.mxu0 %v1590_v16 }
  0x7f   : > { %652 = vmatmul.mubr.bf16.gmra.mxu0 %v1461_v48 }
  0x80   : > { %661 = vmatprep.mubr.bf16.mxu0 %v1590_v16 }
  0x87   : > { %662 = vmatmul.mubr.bf16.gmra.mxu0 %v1462_v49 }
  0x88   : > { %671 = vmatprep.mubr.bf16.mxu0 %v1590_v16 }
  0x8f   : > { %672 = vmatmul.mubr.bf16.gmra.mxu0 %v1463_v50 }
 0x117   : > { %v603_v62 = vpop.f32.mrf.mxu0 }
 0x118   : > { %v604_v5 = vadd.f32 %v603_v62, %v1816_v0 }
 0x119   : > { %v605_v1 = vpop.f32.mrf.mxu0 }
 0x11a   : > { %v606_v3 = vadd.f32 %v605_v1, %v1814_v63  ;;  %v682_v12 = vmax.f32 %v604_v5, 0.0 }
 0x11b   : > { %v607_v2 = vpop.f32.mrf.mxu0 }
 0x11c   : > { %v608_v4 = vadd.f32 %v607_v2, %v1816_v0  ;;  %v683_v10 = vmax.f32 %v606_v3, 0.0 }
 0x11d   : > { %v609_v6 = vpop.f32.mrf.mxu0 }
 0x11e   : > { %v610_v7 = vadd.f32 %v609_v6, %v1814_v63  ;;  %v684_v8 = vmax.f32 %v608_v4, 0.0 }
 0x11f   : > { %v613_v9 = vpop.f32.mrf.mxu0 }
 0x120   : > { %v685_v11 = vmax.f32 %v610_v7, 0.0  ;;  %v714_v15 = vpack.c.bf16 %v684_v8, %v682_v12  ;;  %v614_v19 = vadd.f32 %v613_v9, %v1816_v0 }
 0x121   : > { %v615_v13 = vpop.f32.mrf.mxu0 }
 0x122   : > { %v715_v14 = vpack.c.bf16 %v685_v11, %v683_v10  ;;  %v616_v17 = vadd.f32 %v615_v13, %v1814_v63  ;;  %v686_v26 = vmax.f32 %v614_v19, 0.0 }
 0x123   : > { %v617_v16 = vpop.f32.mrf.mxu0 }
 0x124   : > { %v618_v18 = vadd.f32 %v617_v16, %v1816_v0  ;;  %890 = vmatprep.mubr.bf16.mxu1 %v715_v14  ;;  %v687_v24 = vmax.f32 %v616_v17, 0.0 }
 0x125   : > { %v619_v20 = vpop.f32.mrf.mxu0  ;;  %891 = vmatmul.mubr.bf16.vlgmr.msra.gmra.mxu1 %v714_v15 }
 0x126   : > { %v620_v21 = vadd.f32 %v619_v20, %v1814_v63  ;;  %v688_v22 = vmax.f32 %v618_v18, 0.0 }
 0x127   : > { %v623_v23 = vpop.f32.mrf.mxu0 }
 0x128   : > { %v689_v25 = vmax.f32 %v620_v21, 0.0  ;;  %v716_v29 = vpack.c.bf16 %v688_v22, %v686_v26  ;;  %v624_v33 = vadd.f32 %v623_v23, %v1816_v0 }
 0x129   : > { %v625_v27 = vpop.f32.mrf.mxu0 }
 0x12a   : > { %v717_v28 = vpack.c.bf16 %v689_v25, %v687_v24  ;;  %v626_v31 = vadd.f32 %v625_v27, %v1814_v63  ;;  %v690_v40 = vmax.f32 %v624_v33, 0.0 }
 0x12b   : > { %v627_v30 = vpop.f32.mrf.mxu0 }
 0x12c   : > { %v628_v32 = vadd.f32 %v627_v30, %v1816_v0  ;;  %898 = vmatprep.mubr.bf16.mxu1 %v717_v28  ;;  %v691_v38 = vmax.f32 %v626_v31, 0.0 }
 0x12d   : > { %v629_v34 = vpop.f32.mrf.mxu0  ;;  %899 = vmatmul.mubr.bf16.gmra.mxu1 %v716_v29 }
 0x12e   : > { %v630_v35 = vadd.f32 %v629_v34, %v1814_v63  ;;  %v692_v36 = vmax.f32 %v628_v32, 0.0 }
 0x12f   : > { %v633_v37 = vpop.f32.mrf.mxu0 }
 0x130   : > { %v693_v39 = vmax.f32 %v630_v35, 0.0  ;;  %v718_v43 = vpack.c.bf16 %v692_v36, %v690_v40  ;;  %v634_v47 = vadd.f32 %v633_v37, %v1816_v0 }
 0x131   : > { %v635_v41 = vpop.f32.mrf.mxu0 }
 0x132   : > { %v719_v42 = vpack.c.bf16 %v693_v39, %v691_v38  ;;  %v636_v45 = vadd.f32 %v635_v41, %v1814_v63  ;;  %v694_v54 = vmax.f32 %v634_v47, 0.0 }
 0x133   : > { %v637_v44 = vpop.f32.mrf.mxu0 }
 0x134   : > { %v638_v46 = vadd.f32 %v637_v44, %v1816_v0  ;;  %906 = vmatprep.mubr.bf16.mxu1 %v719_v42  ;;  %v695_v52 = vmax.f32 %v636_v45, 0.0 }
 0x135   : > { %v639_v48 = vpop.f32.mrf.mxu0  ;;  %907 = vmatmul.mubr.bf16.gmra.mxu1 %v718_v43 }
 0x136   : > { %v640_v49 = vadd.f32 %v639_v48, %v1814_v63  ;;  %v696_v50 = vmax.f32 %v638_v46, 0.0 }
 0x137   : > { %v643_v51 = vpop.f32.mrf.mxu0 }
 0x138   : > { %v697_v53 = vmax.f32 %v640_v49, 0.0  ;;  %v720_v57 = vpack.c.bf16 %v696_v50, %v694_v54  ;;  %v644_v61 = vadd.f32 %v643_v51, %v1816_v0 }
 0x139   : > { %v645_v55 = vpop.f32.mrf.mxu0 }
 0x13a   : > { %v721_v56 = vpack.c.bf16 %v697_v53, %v695_v52  ;;  %v646_v59 = vadd.f32 %v645_v55, %v1814_v63  ;;  %v698_v6 = vmax.f32 %v644_v61, 0.0 }
 0x13b   : > { %v647_v58 = vpop.f32.mrf.mxu0 }
 0x13c   : > { %v648_v60 = vadd.f32 %v647_v58, %v1816_v0  ;;  %914 = vmatprep.mubr.bf16.mxu1 %v721_v56  ;;  %v699_v4 = vmax.f32 %v646_v59, 0.0 }
 0x13d   : > { %v649_v62 = vpop.f32.mrf.mxu0  ;;  %915 = vmatmul.mubr.bf16.gmra.mxu1 %v720_v57 }
 0x13e   : > { %v650_v1 = vadd.f32 %v649_v62, %v1814_v63  ;;  %v700_v2 = vmax.f32 %v648_v60, 0.0 }
 0x13f   : > { %v653_v3 = vpop.f32.mrf.mxu0 }
 0x140   : > { %v701_v5 = vmax.f32 %v650_v1, 0.0  ;;  %v722_v9 = vpack.c.bf16 %v700_v2, %v698_v6  ;;  %v654_v13 = vadd.f32 %v653_v3, %v1816_v0 }
 0x141   : > { %v655_v7 = vpop.f32.mrf.mxu0 }
 0x142   : > { %v723_v8 = vpack.c.bf16 %v701_v5, %v699_v4  ;;  %v656_v11 = vadd.f32 %v655_v7, %v1814_v63  ;;  %v702_v20 = vmax.f32 %v654_v13, 0.0 }
 0x143   : > { %v657_v10 = vpop.f32.mrf.mxu0 }
 0x144   : > { %v658_v12 = vadd.f32 %v657_v10, %v1816_v0  ;;  %922 = vmatprep.mubr.bf16.mxu1 %v723_v8  ;;  %v703_v18 = vmax.f32 %v656_v11, 0.0 }
 0x145   : > { %v659_v14 = vpop.f32.mrf.mxu0  ;;  %923 = vmatmul.mubr.bf16.gmra.mxu1 %v722_v9 }
 0x146   : > { %v660_v15 = vadd.f32 %v659_v14, %v1814_v63  ;;  %v704_v16 = vmax.f32 %v658_v12, 0.0 }
 0x147   : > { %v663_v17 = vpop.f32.mrf.mxu0 }
 0x148   : > { %v705_v19 = vmax.f32 %v660_v15, 0.0  ;;  %v724_v23 = vpack.c.bf16 %v704_v16, %v702_v20  ;;  %v664_v27 = vadd.f32 %v663_v17, %v1816_v0 }
 0x149   : > { %v665_v21 = vpop.f32.mrf.mxu0 }
 0x14a   : > { %v725_v22 = vpack.c.bf16 %v705_v19, %v703_v18  ;;  %v666_v25 = vadd.f32 %v665_v21, %v1814_v63  ;;  %v706_v34 = vmax.f32 %v664_v27, 0.0 }
 0x14b   : > { %v667_v24 = vpop.f32.mrf.mxu0 }
 0x14c   : > { %v668_v26 = vadd.f32 %v667_v24, %v1816_v0  ;;  %930 = vmatprep.mubr.bf16.mxu1 %v725_v22  ;;  %v707_v32 = vmax.f32 %v666_v25, 0.0 }
 0x14d   : > { %v669_v28 = vpop.f32.mrf.mxu0  ;;  %931 = vmatmul.mubr.bf16.gmra.mxu1 %v724_v23 }
 0x14e   : > { %v670_v29 = vadd.f32 %v669_v28, %v1814_v63  ;;  %v708_v30 = vmax.f32 %v668_v26, 0.0 }
 0x14f   : > { %v673_v31 = vpop.f32.mrf.mxu0 }
 0x150   : > { %v709_v33 = vmax.f32 %v670_v29, 0.0  ;;  %v726_v37 = vpack.c.bf16 %v708_v30, %v706_v34  ;;  %v674_v41 = vadd.f32 %v673_v31, %v1816_v0 }
 0x151   : > { %v675_v35 = vpop.f32.mrf.mxu0 }
 0x152   : > { %v727_v36 = vpack.c.bf16 %v709_v33, %v707_v32  ;;  %v676_v39 = vadd.f32 %v675_v35, %v1814_v63  ;;  %v710_v47 = vmax.f32 %v674_v41, 0.0 }
 0x153   : > { %v677_v38 = vpop.f32.mrf.mxu0 }
 0x154   : > { %v678_v40 = vadd.f32 %v677_v38, %v1816_v0  ;;  %938 = vmatprep.mubr.bf16.mxu1 %v727_v36  ;;  %v711_v45 = vmax.f32 %v676_v39, 0.0 }
 0x155   : > { %v679_v42 = vpop.f32.mrf.mxu0  ;;  %939 = vmatmul.mubr.bf16.gmra.mxu1 %v726_v37 }
 0x156   : > { %v680_v43 = vadd.f32 %v679_v42, %v1814_v63  ;;  %v712_v44 = vmax.f32 %v678_v40, 0.0 }
 0x158   : > { %v713_v46 = vmax.f32 %v680_v43, 0.0  ;;  %v728_v49 = vpack.c.bf16 %v712_v44, %v710_v47 }
 0x15a   : > { %v729_v48 = vpack.c.bf16 %v713_v46, %v711_v45 }
 0x15c   : > { %946 = vmatprep.mubr.bf16.mxu1 %v729_v48 }
 0x15d   : > { %947 = vmatmul.mubr.bf16.gmra.mxu1 %v728_v49 }
 0x1e5   : > { %v1294_v50 = vpop.f32.mrf.mxu1 }
 0x1e7   : > { %v1295_v51 = vpop.f32.mrf.mxu1 }
 0x1e8   : > { %v1850_v52 = vadd.f32 %v1295_v51, %v1294_v50 }
 0x1e9   : > { %v1297_v53 = vpop.f32.mrf.mxu1 }
 0x1eb   : > { %v1298_v54 = vpop.f32.mrf.mxu1 }
 0x1ec   : > { %v1852_v55 = vadd.f32 %v1298_v54, %v1297_v53 }
 0x1ed   : > { %v1300_v0 = vpop.f32.mrf.mxu1 }
 0x1ef   : > { %v1301_v56 = vpop.f32.mrf.mxu1 }
 0x1f0   : > { %v1854_v57 = vadd.f32 %v1301_v56, %v1300_v0 }
 0x1f1   : > { %v1303_v63 = vpop.f32.mrf.mxu1 }
 0x1f3   : > { %v1304_v58 = vpop.f32.mrf.mxu1 }
 0x1f4   : > { %v1856_v59 = vadd.f32 %v1304_v58, %v1303_v63 }
 0x1f5   : > { %v1306_v60 = vpop.f32.mrf.mxu1 }
 0x1f7   : > { %v1307_v61 = vpop.f32.mrf.mxu1 }
 0x1f8   : > { %v1858_v62 = vadd.f32 %v1307_v61, %v1306_v60 }
 0x1f9   : > { %v1309_v1 = vpop.f32.mrf.mxu1 }
 0x1fb   : > { %v1310_v2 = vpop.f32.mrf.mxu1 }
 0x1fc   : > { %v1860_v3 = vadd.f32 %v1310_v2, %v1309_v1 }
 0x1fd   : > { %v1312_v4 = vpop.f32.mrf.mxu1 }
 0x1ff   : > { %v1313_v5 = vpop.f32.mrf.mxu1 }
 0x200   : > { %v1862_v6 = vadd.f32 %v1313_v5, %v1312_v4 }
 0x201   : > { %v1315_v7 = vpop.f32.mrf.mxu1 }
 0x203   : > { %v1316_v8 = vpop.f32.mrf.mxu1 }
 0x204   : > { %v1864_v9 = vadd.f32 %v1316_v8, %v1315_v7 }
 0x205   : > { %v1318_v10 = vpop.f32.mrf.mxu1 }
 0x207   : > { %v1319_v11 = vpop.f32.mrf.mxu1 }
 0x208   : > { %v1866_v12 = vadd.f32 %v1319_v11, %v1318_v10 }
 0x209   : > { %v1321_v13 = vpop.f32.mrf.mxu1 }
 0x20b   : > { %v1322_v14 = vpop.f32.mrf.mxu1 }
 0x20c   : > { %v1868_v15 = vadd.f32 %v1322_v14, %v1321_v13 }
 0x20d   : > { %v1324_v16 = vpop.f32.mrf.mxu1 }
 0x20f   : > { %v1325_v17 = vpop.f32.mrf.mxu1 }
 0x210   : > { %v1870_v18 = vadd.f32 %v1325_v17, %v1324_v16 }
 0x211   : > { %v1327_v19 = vpop.f32.mrf.mxu1 }
 0x213   : > { %v1328_v20 = vpop.f32.mrf.mxu1 }
 0x214   : > { %v1872_v21 = vadd.f32 %v1328_v20, %v1327_v19 }
 0x215   : > { %v1330_v22 = vpop.f32.mrf.mxu1 }
 0x217   : > { %v1331_v23 = vpop.f32.mrf.mxu1 }
 0x218   : > { %v1874_v24 = vadd.f32 %v1331_v23, %v1330_v22 }
 0x219   : > { %v1333_v25 = vpop.f32.mrf.mxu1 }
 0x21b   : > { %v1334_v26 = vpop.f32.mrf.mxu1 }
 0x21c   : > { %v1876_v27 = vadd.f32 %v1334_v26, %v1333_v25 }
 0x21d   : > { %v1336_v28 = vpop.f32.mrf.mxu1 }
 0x21f   : > { %v1337_v29 = vpop.f32.mrf.mxu1 }
 0x220   : > { %v1878_v30 = vadd.f32 %v1337_v29, %v1336_v28  ;;  %958 = sbr.rel (%p1267_p6) target bundleno = 557 (0x22d), region = 82 }
 0x221   : > { %v1339_v31 = vpop.f32.mrf.mxu1 }
 0x223   : > { %v1340_v32 = vpop.f32.mrf.mxu1 }
 0x224   : > { %v1880_v33 = vadd.f32 %v1340_v32, %v1339_v31 }
 0x225   : > { %959 = vst [vmem:[#allocation2 + $0x30] sm:$0xff] %v1850_v52  ;;  %960 = vst [vmem:[#allocation2] sm:$0xff] %v1852_v55 }
 0x226   : > { %961 = vst [vmem:[#allocation2 + $0x58] sm:$0xff] %v1854_v57  ;;  %962 = vst [vmem:[#allocation2 + $0x18] sm:$0xff] %v1856_v59 }
 0x227   : > { %963 = vst [vmem:[#allocation2 + $0x50] sm:$0xff] %v1858_v62  ;;  %964 = vst [vmem:[#allocation2 + $0x68] sm:$0xff] %v1860_v3 }
 0x228   : > { %965 = vst [vmem:[#allocation2 + $0x8] sm:$0xff] %v1862_v6  ;;  %966 = vst [vmem:[#allocation2 + $0x48] sm:$0xff] %v1864_v9 }
 0x229   : > { %967 = vst [vmem:[#allocation2 + $0x40] sm:$0xff] %v1866_v12  ;;  %968 = vst [vmem:[#allocation2 + $0x20] sm:$0xff] %v1868_v15 }
 0x22a   : > { %969 = vst [vmem:[#allocation2 + $0x10] sm:$0xff] %v1870_v18  ;;  %970 = vst [vmem:[#allocation2 + $0x38] sm:$0xff] %v1872_v21 }
 0x22b   : > { %971 = vst [vmem:[#allocation2 + $0x60] sm:$0xff] %v1874_v24  ;;  %972 = vst [vmem:[#allocation2 + $0x70] sm:$0xff] %v1876_v27 }
 0x22c   : > { %973 = vst [vmem:[#allocation2 + $0x78] sm:$0xff] %v1878_v30  ;;  %974 = vst [vmem:[#allocation2 + $0x28] sm:$0xff] %v1880_v33 }
 0x22d PF: > { %p1268_p7 = scmp.le.s32.totalorder %s1572_s23, 0 }
 0x22f   : > { %978 = sbr.rel (%p1268_p7) target bundleno = 575 (0x23f), region = 86 }
 0x234   : > { %v979_v34 = vld [vmem:[#allocation2 + $0x30] sm:$0xff]  ;;  %v980_v35 = vld [vmem:[#allocation2] sm:$0xff]  ;;  %v981_v36 = vld [vmem:[#allocation2 + $0x58] sm:$0xff] }
 0x235   : > { %v995_v37 = vadd.f32 %v1850_v52, %v979_v34  ;;  %v996_v38 = vadd.f32 %v1852_v55, %v980_v35  ;;  %v997_v39 = vadd.f32 %v1854_v57, %v981_v36  ;;  %v982_v40 = vld [vmem:[#allocation2 + $0x18] sm:$0xff]  ;;  %v983_v41 = vld [vmem:[#allocation2 + $0x50] sm:$0xff]  ;;  %v984_v42 = vld [vmem:[#allocation2 + $0x68] sm:$0xff] }
 0x236   : > { %v998_v43 = vadd.f32 %v1856_v59, %v982_v40  ;;  %v999_v44 = vadd.f32 %v1858_v62, %v983_v41  ;;  %v1000_v45 = vadd.f32 %v1860_v3, %v984_v42  ;;  %v985_v46 = vld [vmem:[#allocation2 + $0x8] sm:$0xff]  ;;  %v987_v48 = vld [vmem:[#allocation2 + $0x40] sm:$0xff]  ;;  %v989_v53 = vld [vmem:[#allocation2 + $0x10] sm:$0xff] }
 0x237   : > { %v986_v47 = vld [vmem:[#allocation2 + $0x48] sm:$0xff]  ;;  %1011 = vst [vmem:[#allocation2 + $0x30] sm:$0xff] %v995_v37  ;;  %1012 = vst [vmem:[#allocation2] sm:$0xff] %v996_v38  ;;  %v1001_v49 = vadd.f32 %v1862_v6, %v985_v46  ;;  %v1003_v51 = vadd.f32 %v1866_v12, %v987_v48  ;;  %v988_v52 = vld [vmem:[#allocation2 + $0x20] sm:$0xff]  ;;  %v1005_v0 = vadd.f32 %v1870_v18, %v989_v53 }
 0x238   : > { %1013 = vst [vmem:[#allocation2 + $0x58] sm:$0xff] %v997_v39  ;;  %v1002_v50 = vadd.f32 %v1864_v9, %v986_v47  ;;  %v990_v54 = vld [vmem:[#allocation2 + $0x38] sm:$0xff]  ;;  %1014 = vst [vmem:[#allocation2 + $0x18] sm:$0xff] %v998_v43  ;;  %v1004_v55 = vadd.f32 %v1868_v15, %v988_v52  ;;  %v991_v57 = vld [vmem:[#allocation2 + $0x60] sm:$0xff] }
 0x239   : > { %1015 = vst [vmem:[#allocation2 + $0x50] sm:$0xff] %v999_v44  ;;  %1016 = vst [vmem:[#allocation2 + $0x68] sm:$0xff] %v1000_v45  ;;  %v1006_v56 = vadd.f32 %v1872_v21, %v990_v54  ;;  %v992_v63 = vld [vmem:[#allocation2 + $0x70] sm:$0xff]  ;;  %v993_v58 = vld [vmem:[#allocation2 + $0x78] sm:$0xff]  ;;  %v1007_v59 = vadd.f32 %v1874_v24, %v991_v57 }
 0x23a   : > { %1017 = vst [vmem:[#allocation2 + $0x8] sm:$0xff] %v1001_v49  ;;  %1018 = vst [vmem:[#allocation2 + $0x48] sm:$0xff] %v1002_v50  ;;  %v1008_v60 = vadd.f32 %v1876_v27, %v992_v63  ;;  %v1009_v61 = vadd.f32 %v1878_v30, %v993_v58  ;;  %v994_v62 = vld [vmem:[#allocation2 + $0x28] sm:$0xff] }
 0x23b   : > { %1019 = vst [vmem:[#allocation2 + $0x40] sm:$0xff] %v1003_v51  ;;  %1020 = vst [vmem:[#allocation2 + $0x20] sm:$0xff] %v1004_v55  ;;  %v1010_v1 = vadd.f32 %v1880_v33, %v994_v62 }
 0x23c   : > { %1021 = vst [vmem:[#allocation2 + $0x10] sm:$0xff] %v1005_v0  ;;  %1022 = vst [vmem:[#allocation2 + $0x38] sm:$0xff] %v1006_v56 }
 0x23d   : > { %1023 = vst [vmem:[#allocation2 + $0x60] sm:$0xff] %v1007_v59  ;;  %1024 = vst [vmem:[#allocation2 + $0x70] sm:$0xff] %v1008_v60 }
 0x23e   : > { %1025 = vst [vmem:[#allocation2 + $0x78] sm:$0xff] %v1009_v61  ;;  %1026 = vst [vmem:[#allocation2 + $0x28] sm:$0xff] %v1010_v1 }
 0x23f PF: > { %p1269_p8 = scmp.ne.s32.totalorder %s1572_s23, 1 }
 0x241   : > { %1030 = sbr.rel (%p1269_p8) target bundleno = 593 (0x251), region = 90 }
 0x246   : > { %v1031_v2 = vld [vmem:[#allocation2 + $0x30] sm:$0xff]  ;;  %v1270_v3 = vld [vmem:[%s2011_s4] ss:$0 sm:$0xff]  ;;  %v1033_v7 = vld [vmem:[#allocation2 + $0x58] sm:$0xff] }
 0x247   : > { %v1032_v4 = vld [vmem:[#allocation2] sm:$0xff]  ;;  %v1054_v5 = vadd.f32 %v1270_v3, %v1031_v2  ;;  %v1034_v8 = vld [vmem:[#allocation2 + $0x18] sm:$0xff]  ;;  %v1035_v9 = vld [vmem:[#allocation2 + $0x50] sm:$0xff]  ;;  %v1056_v10 = vadd.f32 %v1270_v3, %v1033_v7 }
 0x248   : > { %v1055_v6 = vadd.f32 %v1270_v3, %v1032_v4  ;;  %v1057_v11 = vadd.f32 %v1270_v3, %v1034_v8  ;;  %v1058_v12 = vadd.f32 %v1270_v3, %v1035_v9  ;;  %v1036_v13 = vld [vmem:[#allocation2 + $0x68] sm:$0xff]  ;;  %v1039_v19 = vld [vmem:[#allocation2 + $0x40] sm:$0xff]  ;;  %v1041_v21 = vld [vmem:[#allocation2 + $0x10] sm:$0xff] }
 0x249   : > { %v1037_v14 = vld [vmem:[#allocation2 + $0x8] sm:$0xff]  ;;  %1070 = vst [vmem:[%s1883_s1] sm:$0xff] %v1054_v5  ;;  %v1059_v16 = vadd.f32 %v1270_v3, %v1036_v13  ;;  %v1040_v20 = vld [vmem:[#allocation2 + $0x20] sm:$0xff]  ;;  %1072 = vst [vmem:[%s1883_s1 + $0x10] sm:$0xff] %v1056_v10  ;;  %v1062_v22 = vadd.f32 %v1270_v3, %v1039_v19  ;;  %v1064_v24 = vadd.f32 %v1270_v3, %v1041_v21 }
 0x24a   : > { %v1038_v15 = vld [vmem:[#allocation2 + $0x48] sm:$0xff]  ;;  %1071 = vst [vmem:[%s1883_s1 + $0x8] sm:$0xff] %v1055_v6  ;;  %v1060_v17 = vadd.f32 %v1270_v3, %v1037_v14  ;;  %1073 = vst [vmem:[%s1883_s1 + $0x18] sm:$0xff] %v1057_v11  ;;  %v1063_v23 = vadd.f32 %v1270_v3, %v1040_v20  ;;  %v1042_v25 = vld [vmem:[#allocation2 + $0x38] sm:$0xff] }
 0x24b   : > { %v1061_v18 = vadd.f32 %v1270_v3, %v1038_v15  ;;  %1074 = vst [vmem:[%s1883_s1 + $0x20] sm:$0xff] %v1058_v12  ;;  %v1043_v26 = vld [vmem:[#allocation2 + $0x60] sm:$0xff]  ;;  %v1044_v27 = vld [vmem:[#allocation2 + $0x70] sm:$0xff]  ;;  %1075 = vst [vmem:[%s1883_s1 + $0x28] sm:$0xff] %v1059_v16  ;;  %v1065_v28 = vadd.f32 %v1270_v3, %v1042_v25 }
 0x24c   : > { %1076 = vst [vmem:[%s1883_s1 + $0x30] sm:$0xff] %v1060_v17  ;;  %v1066_v29 = vadd.f32 %v1270_v3, %v1043_v26  ;;  %v1067_v30 = vadd.f32 %v1270_v3, %v1044_v27  ;;  %v1045_v31 = vld [vmem:[#allocation2 + $0x78] sm:$0xff]  ;;  %v1046_v32 = vld [vmem:[#allocation2 + $0x28] sm:$0xff]  ;;  %1078 = vst [vmem:[%s1883_s1 + $0x40] sm:$0xff] %v1062_v22 }
 0x24d   : > { %1077 = vst [vmem:[%s1883_s1 + $0x38] sm:$0xff] %v1061_v18  ;;  %1079 = vst [vmem:[%s1883_s1 + $0x48] sm:$0xff] %v1063_v23  ;;  %v1068_v33 = vadd.f32 %v1270_v3, %v1045_v31  ;;  %v1069_v34 = vadd.f32 %v1270_v3, %v1046_v32 }
 0x24e   : > { %1080 = vst [vmem:[%s1883_s1 + $0x50] sm:$0xff] %v1064_v24  ;;  %1081 = vst [vmem:[%s1883_s1 + $0x58] sm:$0xff] %v1065_v28 }
 0x24f   : > { %1082 = vst [vmem:[%s1883_s1 + $0x60] sm:$0xff] %v1066_v29  ;;  %1083 = vst [vmem:[%s1883_s1 + $0x68] sm:$0xff] %v1067_v30 }
 0x250   : > { %1084 = vst [vmem:[%s1883_s1 + $0x70] sm:$0xff] %v1068_v33  ;;  %1085 = vst [vmem:[%s1883_s1 + $0x78] sm:$0xff] %v1069_v34 }
 0x251 PF: > { %s1277_s23 = sshll.u32 %s1576_s24, 11  ;;  %s1100_s7 = sshll.u32 %s1883_s1, 4  ;;  %s1946_s7 = int_to_ptr.vmem [resolvable:$true] %s1100_s7 }
 0x252   : > { %s1943_s16 = scalar_lea.hbm %s2012_s5, %s1277_s23  ;;  %s2019_s12 = sand.u32 1, %s1556_s19  }
 0x253   : > { %s1950_s28 = scalar_lea.sflag [#allocation5], %s2019_s12  ;;  %s1480_s21 = scalar_lea.vmem %s1946_s7, 2048 }
 0x254   : > { %p1481_p9 = scmp.ne.s32.totalorder %s1946_s7, %s1480_s21  ;;  %s1591_s24 = smov [#allocation4]  }
 0x255   : > { %s1484_s8 = sshll.u32 %s1591_s24, 4  ;;  %s1485_s8 = int_to_ptr.vmem [resolvable:$false] %s1484_s8 }
 0x256   : > { %p1482_p11 = pnand %p1481_p9, %p1703_p10  ;;  %s1486_s17 = scalar_lea.vmem %s1485_s8, 4096 }
 0x257   : > { %p1487_p0 = scmp.lt.s32.totalorder %s1946_s7, %s1485_s8  ;;  %p1488_p1 = scmp.lt.s32.totalorder %s1486_s17, %s1480_s21 }
 0x258   : > { %p1483_p13 = pneg %p1482_p11 }
 0x259   : > { %p1489_p2 = por %p1488_p1, %p1487_p0 }
 0x25b   : > { %p1490_p3 = pnand %p1489_p2, %p1483_p13 }
 0x25d   : > { %1493 = shalt.err (!%p1490_p3)
}
 0x25e   : > { %s1494_s1 = scalar_lea.hbm %s1943_s16, 2048  ;;  %s1498_s9 = scalar_lea.hbm %s2012_s5, 4096 }
 0x25f   : > { %p1495_p4 = scmp.ne.s32.totalorder %s1943_s16, %s1494_s1  ;;  %p1499_p7 = scmp.lt.s32.totalorder %s1943_s16, %s2012_s5 }
 0x260   : > { %p1500_p8 = scmp.lt.s32.totalorder %s1498_s9, %s1494_s1 }
 0x261   : > { %p1496_p5 = pnand %p1495_p4, %p1703_p10 }
 0x262   : > { %p1501_p9 = por %p1500_p8, %p1499_p7 }
 0x263   : > { %p1497_p6 = pneg %p1496_p5 }
 0x265   : > { %p1502_p11 = pnand %p1501_p9, %p1497_p6 }
 0x267   : > { %1505 = shalt.err (!%p1502_p11)
}
 0x268   : > { %s1592_s21 = smov 128   ;;  %s1593_s24 = smov 8  }
 0x269   : > { %1342 = dma.vmem_to_hbm [thread:$0]  (%p1703_p10), %s1946_s7, 2048, %s1943_s16, %s1950_s28, %s1592_s21, %s1592_s21, %s1593_s24  }
 0x26a PF: > { %p1348_p13 = scmp.ge.s32.totalorder %s1588_s27, 2  ;;  %s1115_s8 = sand.u32 1, %s1552_s18  }
 0x26b   : > { %s1116_s17 = scalar_lea.sflag [#allocation5], %s1115_s8 }
 0x26c   : > { %p1345_p0 = pnand %p1348_p13, %p1710_p12 }
 0x26e   : > { %p1346_p1 = pneg %p1345_p0 }
 0x270   : > { %1547 = dma.done.wait (%p1346_p1), %s1116_s17, 2048  }
 0x271   : > { %1549 = vsyncadd (%p1346_p1), %s1116_s17, 4294965248  ;;  %s18_s27 = sadd.s32 1, %s1588_s27   ;;  %s2020_s18 = smov %s1556_s19 }
 0x272   : > { %p15_p2 = scmp.ge.s32.totalorder %s18_s27, 6   ;;  %s2021_s19 = smov %s1560_s20 }
 0x273   : > { %s2022_s20 = smov %s1708_s14  ;;  %s2023_s21 = smov %s1568_s22 }
 0x274   : > { %s2024_s22 = smov %s1697_s11  ;;  %s2025_s23 = smov %s1580_s25 }
 0x275   : > { %s2026_s24 = smov %s1584_s26  ;;  %s2027_s25 = smov %s2030_s30 }
 0x276   : > { %s2028_s26 = smov %s2034_s6  ;;  %17 = sbr.rel (!%p15_p2) target bundleno = 8 (0x8), region = 139 }
 0x27b   :  { %1121 = vsyncpa [#allocation5], 1 }
 0x27c   :  { %1123 = vsyncpa [#allocation5 + $0x1], 1 }

</bundles_post_ra>
